<compile_context>
chip_gen: v7x
topology: tpu7x:2x2x1
jax: 0.10.0
libtpu: 0.0.40
codegen_flags: <defaults>
</compile_context>

<pallas_src>
import functools

import jax
import jax.numpy as jnp
from jax.experimental import pallas as pl
from jax.experimental.pallas import tpu as pltpu

_SMOOTH = 1.0
_LANE = 128
_SUBLANE = 8
_TILE_R_MAX = 4096                 # rows per block -> (4096, 128) f32 = 2 MiB
_VMEM_LIMIT = 32 * 1024 * 1024     # fits v5e/v6e (128 MiB) and v7x (64 MiB)


def _round_up(x, m):
    return ((x + m - 1) // m) * m


def _num_tensorcores():
    """Best-effort TensorCores-per-JAX-device (megacore split factor).

    v5e / v6e (and v2/v3 devices) expose one TensorCore per device, so a
    2-way split there only adds overhead.  v4 / v5p (megacore) and v7x have
    two TensorCores behind one device.  Defaults to 1 (always correct).
    """
    try:
        kind = jax.devices()[0].device_kind.lower()
    except Exception:
        return 1
    if "lite" in kind or "v5e" in kind or "v6" in kind or "v2" in kind or "v3" in kind:
        return 1
    if "v4" in kind or "v5" in kind or "7" in kind:
        return 2
    return 1


def _tpr_kernel(t_ref, x_ref, o_ref, acc_tp_ref, acc_t_ref, *,
                rows, tile_r, steps):
    c = pl.program_id(0)   # core index ("parallel"; each core owns a row chunk)
    s = pl.program_id(1)   # reduction step within this core's chunk ("arbitrary")

    @pl.when(s == 0)
    def _init():
        acc_tp_ref[...] = jnp.zeros_like(acc_tp_ref)
        acc_t_ref[...] = jnp.zeros_like(acc_t_ref)

    row0 = (c * steps + s) * tile_r
    groups = tile_r // _SUBLANE

    def accumulate(t, x):
        # Fold the (tile_r, 128) tile down to a single (8, 128) partial sum
        # before the += : pure VPU adds, tiny accumulator RMW traffic.
        tp3 = (t * x).reshape(groups, _SUBLANE, _LANE)
        t3 = t.reshape(groups, _SUBLANE, _LANE)
        acc_tp_ref[...] += jnp.sum(tp3, axis=0)
        acc_t_ref[...] += jnp.sum(t3, axis=0)

    # Fast path: fully in-range block, no masking at all.
    @pl.when(row0 + tile_r <= rows)
    def _full():
        accumulate(t_ref[...].astype(jnp.float32),
                   x_ref[...].astype(jnp.float32))

    # Tail path (at most one block per core on realistic shapes): mask rows
    # beyond `rows`.  Both operands are masked so undefined values in the
    # DMA-padded region of a partial boundary block cannot poison the sum.
    @pl.when(row0 + tile_r > rows)
    def _tail():
        n_valid = rows - row0           # may be <= 0 for a fully-OOB block
        row_ids = jax.lax.broadcasted_iota(jnp.int32, (tile_r, _LANE), 0)
        valid = row_ids < n_valid
        t = jnp.where(valid, t_ref[...].astype(jnp.float32), 0.0)
        x = jnp.where(valid, x_ref[...].astype(jnp.float32), 0.0)
        accumulate(t, x)

    @pl.when(s == steps - 1)
    def _finalize():
        o_ref[0, 0] = jnp.sum(acc_tp_ref[...])   # sum(target * input)
        o_ref[0, 1] = jnp.sum(acc_t_ref[...])    # sum(target)


def true_positive_rate(target, inp):
    """TruePositiveRate.forward(target, input) -> scalar f32.

    1.0 - sum(target * input) / (sum(target) + _SMOOTH)
    """
    # TODO(synk): is_mask_exclude=True path (_compute_masked, masking out
    # target == value_mask_exclude) not implemented; default ctor is False.
    t = target.reshape(-1)   # native dtype; cast happens on the VPU in-kernel
    x = inp.reshape(-1)
    n = t.shape[0]

    n_pad = _round_up(n, _LANE)
    if n_pad != n:
        # TODO(synk): lane-ragged sizes fall back to jnp.pad (full HBM copy);
        # typical NCHW element counts are multiples of 128 and skip this.
        t = jnp.pad(t, (0, n_pad - n))
        x = jnp.pad(x, (0, n_pad - n))

    t2 = t.reshape(-1, _LANE)
    x2 = x.reshape(-1, _LANE)
    rows = t2.shape[0]

    ncores = _num_tensorcores()
    # Exact per-core sizing: each core streams a disjoint contiguous chunk of
    # steps * tile_r rows.  tile_r is derived from the row count (multiple of
    # 8, <= _TILE_R_MAX) so the chunks cover the array with at most a few
    # 8-row groups of slack -- no fully-masked duplicate block fetches.
    rows_per_core = _round_up(pl.cdiv(rows, ncores), _SUBLANE)
    steps = pl.cdiv(rows_per_core, _TILE_R_MAX)
    tile_r = _round_up(pl.cdiv(rows_per_core, steps), _SUBLANE)
    last_block = pl.cdiv(rows, tile_r) - 1   # clamp target for degenerate tails

    def in_index_map(c, s):
        # Clamp keeps the DMA window in-bounds for the (tiny-input-only)
        # fully-out-of-range tail block; the kernel's row mask zeroes it.
        return (jnp.minimum(c * steps + s, last_block), 0)

    kernel = functools.partial(
        _tpr_kernel, rows=rows, tile_r=tile_r, steps=steps)

    in_bytes = t2.size * t2.dtype.itemsize + x2.size * x2.dtype.itemsize
    partials = pl.pallas_call(
        kernel,
        out_shape=jax.ShapeDtypeStruct((ncores, 2), jnp.float32),
        grid=(ncores, steps),
        in_specs=[
            pl.BlockSpec((tile_r, _LANE), in_index_map),
            pl.BlockSpec((tile_r, _LANE), in_index_map),
        ],
        out_specs=pl.BlockSpec((1, 2), lambda c, s: (c, 0),
                               memory_space=pltpu.SMEM),
        scratch_shapes=[
            pltpu.VMEM((_SUBLANE, _LANE), jnp.float32),
            pltpu.VMEM((_SUBLANE, _LANE), jnp.float32),
        ],
        compiler_params=pltpu.CompilerParams(
            dimension_semantics=("parallel", "arbitrary"),
            vmem_limit_bytes=_VMEM_LIMIT),
        cost_estimate=pl.CostEstimate(
            flops=3 * rows * _LANE,
            transcendentals=0,
            bytes_accessed=in_bytes + ncores * 2 * 4),
    )(t2, x2)

    sum_tp = jnp.sum(partials[:, 0])
    sum_t = jnp.sum(partials[:, 1])
    return 1.0 - sum_tp / (sum_t + jnp.float32(_SMOOTH))


def _reference(target, inp):
    t = target.reshape(-1).astype(jnp.float32)
    x = inp.reshape(-1).astype(jnp.float32)
    return 1.0 - jnp.sum(t * x) / (jnp.sum(t) + jnp.float32(_SMOOTH))


if __name__ == "__main__":
    key = jax.random.PRNGKey(0)
    k1, k2 = jax.random.split(key)
    # NCHW segmentation-style inputs: batch=2, channels=4, spatial=16x16
    target = jax.random.bernoulli(k1, p=0.3, shape=(2, 4, 16, 16)).astype(
        jnp.float32
    )
    pred = jax.random.uniform(k2, (2, 4, 16, 16), dtype=jnp.float32)

    out = true_positive_rate(target, pred)
    out = jax.block_until_ready(out)

    ref = _reference(target, pred)
    assert jnp.allclose(out, ref, rtol=1e-5, atol=1e-5), (out, ref)
    print("KERNEL_OK")
</pallas_src>

<mosaic_0001>
module attributes {stable_mosaic.version = 11 : i64} {
  func.func @_tpr_kernel(%arg0: i32, %arg1: i32, %arg2: memref<16x128xf32, #tpu.memory_space<vmem>>, %arg3: memref<16x128xf32, #tpu.memory_space<vmem>>, %arg4: memref<1x2xf32, #tpu.memory_space<smem>>, %arg5: memref<8x128xf32, #tpu.memory_space<vmem>>, %arg6: memref<8x128xf32, #tpu.memory_space<vmem>>) attributes {dimension_semantics = [#tpu.dimension_semantics<parallel>, #tpu.dimension_semantics<arbitrary>], iteration_bounds = array<i64: 1, 1>, scalar_prefetch = 0 : i64, scratch_operands = 2 : i64, tpu.core_type = #tpu.core_type<tc>, window_params = [{transform_indices = @transform_0, window_bounds = array<i64: 16, 128>}, {transform_indices = @transform_1, window_bounds = array<i64: 16, 128>}, {transform_indices = @transform_2, window_bounds = array<i64: 1, 2>}]} {
    %c0_i32 = arith.constant 0 : i32
    %0 = arith.cmpi eq, %arg1, %c0_i32 : i32
    %1 = arith.extui %0 : i1 to i32
    %c0_i32_0 = arith.constant 0 : i32
    %2 = arith.cmpi ne, %1, %c0_i32_0 : i32
    scf.if %2 {
      %cst = arith.constant 0.000000e+00 : f32
      %17 = vector.broadcast %cst : f32 to vector<8x128xf32>
      %c0 = arith.constant 0 : index
      %c0_9 = arith.constant 0 : index
      %18 = vector.load %arg5[%c0, %c0_9] : memref<8x128xf32, #tpu.memory_space<vmem>>, vector<8x128xf32>
      tpu.vector_store %arg5[%c0, %c0_9], %17 {strides = array<i32>} : memref<8x128xf32, #tpu.memory_space<vmem>>, vector<8x128xf32>,
      %cst_10 = arith.constant 0.000000e+00 : f32
      %19 = vector.broadcast %cst_10 : f32 to vector<8x128xf32>
      %c0_11 = arith.constant 0 : index
      %c0_12 = arith.constant 0 : index
      %20 = vector.load %arg6[%c0_11, %c0_12] : memref<8x128xf32, #tpu.memory_space<vmem>>, vector<8x128xf32>
      tpu.vector_store %arg6[%c0_11, %c0_12], %19 {strides = array<i32>} : memref<8x128xf32, #tpu.memory_space<vmem>>, vector<8x128xf32>,
    } else {
    }
    %c1_i32 = arith.constant 1 : i32
    %3 = arith.muli %arg0, %c1_i32 : i32
    %4 = arith.addi %3, %arg1 : i32
    %c16_i32 = arith.constant 16 : i32
    %5 = arith.muli %4, %c16_i32 : i32
    %c16_i32_1 = arith.constant 16 : i32
    %6 = arith.addi %5, %c16_i32_1 : i32
    %c16_i32_2 = arith.constant 16 : i32
    %7 = arith.cmpi sle, %6, %c16_i32_2 : i32
    %8 = arith.extui %7 : i1 to i32
    %c0_i32_3 = arith.constant 0 : i32
    %9 = arith.cmpi ne, %8, %c0_i32_3 : i32
    scf.if %9 {
      %c0 = arith.constant 0 : index
      %c0_9 = arith.constant 0 : index
      %17 = vector.load %arg2[%c0, %c0_9] : memref<16x128xf32, #tpu.memory_space<vmem>>, vector<16x128xf32>
      %c0_10 = arith.constant 0 : index
      %c0_11 = arith.constant 0 : index
      %18 = vector.load %arg3[%c0_10, %c0_11] : memref<16x128xf32, #tpu.memory_space<vmem>>, vector<16x128xf32>
      %19 = arith.mulf %17, %18 : vector<16x128xf32>
      %20 = vector.shape_cast %19 : vector<16x128xf32> to vector<2x8x128xf32>
      %21 = vector.shape_cast %17 : vector<16x128xf32> to vector<2x8x128xf32>
      %c0_12 = arith.constant 0 : index
      %c0_13 = arith.constant 0 : index
      %22 = vector.load %arg5[%c0_12, %c0_13] : memref<8x128xf32, #tpu.memory_space<vmem>>, vector<8x128xf32>
      %cst = arith.constant dense<0.000000e+00> : vector<8x128xf32>
      %23 = vector.multi_reduction <add>, %20, %cst [0] : vector<2x8x128xf32> to vector<8x128xf32>
      %24 = arith.addf %22, %23 : vector<8x128xf32>
      %c0_14 = arith.constant 0 : index
      %c0_15 = arith.constant 0 : index
      %25 = vector.load %arg5[%c0_14, %c0_15] : memref<8x128xf32, #tpu.memory_space<vmem>>, vector<8x128xf32>
      tpu.vector_store %arg5[%c0_14, %c0_15], %24 {strides = array<i32>} : memref<8x128xf32, #tpu.memory_space<vmem>>, vector<8x128xf32>,
      %c0_16 = arith.constant 0 : index
      %c0_17 = arith.constant 0 : index
      %26 = vector.load %arg6[%c0_16, %c0_17] : memref<8x128xf32, #tpu.memory_space<vmem>>, vector<8x128xf32>
      %cst_18 = arith.constant dense<0.000000e+00> : vector<8x128xf32>
      %27 = vector.multi_reduction <add>, %21, %cst_18 [0] : vector<2x8x128xf32> to vector<8x128xf32>
      %28 = arith.addf %26, %27 : vector<8x128xf32>
      %c0_19 = arith.constant 0 : index
      %c0_20 = arith.constant 0 : index
      %29 = vector.load %arg6[%c0_19, %c0_20] : memref<8x128xf32, #tpu.memory_space<vmem>>, vector<8x128xf32>
      tpu.vector_store %arg6[%c0_19, %c0_20], %28 {strides = array<i32>} : memref<8x128xf32, #tpu.memory_space<vmem>>, vector<8x128xf32>,
    } else {
    }
    %c16_i32_4 = arith.constant 16 : i32
    %10 = arith.addi %5, %c16_i32_4 : i32
    %c16_i32_5 = arith.constant 16 : i32
    %11 = arith.cmpi sgt, %10, %c16_i32_5 : i32
    %12 = arith.extui %11 : i1 to i32
    %c0_i32_6 = arith.constant 0 : i32
    %13 = arith.cmpi ne, %12, %c0_i32_6 : i32
    scf.if %13 {
      %c16_i32_9 = arith.constant 16 : i32
      %17 = arith.subi %c16_i32_9, %5 : i32
      %18 = tpu.iota {dimensions = array<i32: 0>} : vector<16x128xi32>
      %19 = vector.broadcast %17 : i32 to vector<16x128xi32>
      %20 = arith.cmpi slt, %18, %19 : vector<16x128xi32>
      %c0 = arith.constant 0 : index
      %c0_10 = arith.constant 0 : index
      %21 = vector.load %arg2[%c0, %c0_10] : memref<16x128xf32, #tpu.memory_space<vmem>>, vector<16x128xf32>
      %cst = arith.constant 0.000000e+00 : f32
      %22 = vector.broadcast %cst : f32 to vector<16x128xf32>
      %23 = arith.select %20, %21, %22 : vector<16x128xi1>, vector<16x128xf32>
      %c0_11 = arith.constant 0 : index
      %c0_12 = arith.constant 0 : index
      %24 = vector.load %arg3[%c0_11, %c0_12] : memref<16x128xf32, #tpu.memory_space<vmem>>, vector<16x128xf32>
      %cst_13 = arith.constant 0.000000e+00 : f32
      %25 = vector.broadcast %cst_13 : f32 to vector<16x128xf32>
      %26 = arith.select %20, %24, %25 : vector<16x128xi1>, vector<16x128xf32>
      %27 = arith.mulf %23, %26 : vector<16x128xf32>
      %28 = vector.shape_cast %27 : vector<16x128xf32> to vector<2x8x128xf32>
      %29 = vector.shape_cast %23 : vector<16x128xf32> to vector<2x8x128xf32>
      %c0_14 = arith.constant 0 : index
      %c0_15 = arith.constant 0 : index
      %30 = vector.load %arg5[%c0_14, %c0_15] : memref<8x128xf32, #tpu.memory_space<vmem>>, vector<8x128xf32>
      %cst_16 = arith.constant dense<0.000000e+00> : vector<8x128xf32>
      %31 = vector.multi_reduction <add>, %28, %cst_16 [0] : vector<2x8x128xf32> to vector<8x128xf32>
      %32 = arith.addf %30, %31 : vector<8x128xf32>
      %c0_17 = arith.constant 0 : index
      %c0_18 = arith.constant 0 : index
      %33 = vector.load %arg5[%c0_17, %c0_18] : memref<8x128xf32, #tpu.memory_space<vmem>>, vector<8x128xf32>
      tpu.vector_store %arg5[%c0_17, %c0_18], %32 {strides = array<i32>} : memref<8x128xf32, #tpu.memory_space<vmem>>, vector<8x128xf32>,
      %c0_19 = arith.constant 0 : index
      %c0_20 = arith.constant 0 : index
      %34 = vector.load %arg6[%c0_19, %c0_20] : memref<8x128xf32, #tpu.memory_space<vmem>>, vector<8x128xf32>
      %cst_21 = arith.constant dense<0.000000e+00> : vector<8x128xf32>
      %35 = vector.multi_reduction <add>, %29, %cst_21 [0] : vector<2x8x128xf32> to vector<8x128xf32>
      %36 = arith.addf %34, %35 : vector<8x128xf32>
      %c0_22 = arith.constant 0 : index
      %c0_23 = arith.constant 0 : index
      %37 = vector.load %arg6[%c0_22, %c0_23] : memref<8x128xf32, #tpu.memory_space<vmem>>, vector<8x128xf32>
      tpu.vector_store %arg6[%c0_22, %c0_23], %36 {strides = array<i32>} : memref<8x128xf32, #tpu.memory_space<vmem>>, vector<8x128xf32>,
    } else {
    }
    %c0_i32_7 = arith.constant 0 : i32
    %14 = arith.cmpi eq, %arg1, %c0_i32_7 : i32
    %15 = arith.extui %14 : i1 to i32
    %c0_i32_8 = arith.constant 0 : i32
    %16 = arith.cmpi ne, %15, %c0_i32_8 : i32
    scf.if %16 {
      %c0 = arith.constant 0 : index
      %c0_9 = arith.constant 0 : index
      %17 = vector.load %arg5[%c0, %c0_9] : memref<8x128xf32, #tpu.memory_space<vmem>>, vector<8x128xf32>
      %18 = vector.shape_cast %17 : vector<8x128xf32> to vector<1x8x128xf32>
      %cst = arith.constant dense<0.000000e+00> : vector<1xf32>
      %19 = vector.multi_reduction <add>, %18, %cst [1, 2] : vector<1x8x128xf32> to vector<1xf32>
      %20 = vector.shape_cast %19 : vector<1xf32> to vector<1x1x1xf32>
      %21 = vector.extract %20[0, 0, 0] : f32 from vector<1x1x1xf32>
      %c0_10 = arith.constant 0 : index
      %c0_11 = arith.constant 0 : index
      %22 = memref.load %arg4[%c0_10, %c0_11] : memref<1x2xf32, #tpu.memory_space<smem>>
      memref.store %21, %arg4[%c0_10, %c0_11] : memref<1x2xf32, #tpu.memory_space<smem>>
      %c0_12 = arith.constant 0 : index
      %c0_13 = arith.constant 0 : index
      %23 = vector.load %arg6[%c0_12, %c0_13] : memref<8x128xf32, #tpu.memory_space<vmem>>, vector<8x128xf32>
      %24 = vector.shape_cast %23 : vector<8x128xf32> to vector<1x8x128xf32>
      %cst_14 = arith.constant dense<0.000000e+00> : vector<1xf32>
      %25 = vector.multi_reduction <add>, %24, %cst_14 [1, 2] : vector<1x8x128xf32> to vector<1xf32>
      %26 = vector.shape_cast %25 : vector<1xf32> to vector<1x1x1xf32>
      %27 = vector.extract %26[0, 0, 0] : f32 from vector<1x1x1xf32>
      %c0_15 = arith.constant 0 : index
      %c1 = arith.constant 1 : index
      %28 = memref.load %arg4[%c0_15, %c1] : memref<1x2xf32, #tpu.memory_space<smem>>
      memref.store %27, %arg4[%c0_15, %c1] : memref<1x2xf32, #tpu.memory_space<smem>>
    } else {
    }
    return
  }
  func.func @transform_0(%arg0: i32, %arg1: i32) -> (i32, i32) {
    %c1_i32 = arith.constant 1 : i32
    %0 = arith.muli %arg0, %c1_i32 : i32
    %1 = arith.addi %0, %arg1 : i32
    %c0_i32 = arith.constant 0 : i32
    %2 = arith.minsi %1, %c0_i32 : i32
    %c0_i32_0 = arith.constant 0 : i32
    %c0_i32_1 = arith.constant 0 : i32
    return %2, %c0_i32_0 : i32, i32
  }
  func.func @transform_1(%arg0: i32, %arg1: i32) -> (i32, i32) {
    %c1_i32 = arith.constant 1 : i32
    %0 = arith.muli %arg0, %c1_i32 : i32
    %1 = arith.addi %0, %arg1 : i32
    %c0_i32 = arith.constant 0 : i32
    %2 = arith.minsi %1, %c0_i32 : i32
    %c0_i32_0 = arith.constant 0 : i32
    %c0_i32_1 = arith.constant 0 : i32
    return %2, %c0_i32_0 : i32, i32
  }
  func.func @transform_2(%arg0: i32, %arg1: i32) -> (i32, i32) {
    %c0_i32 = arith.constant 0 : i32
    %c0_i32_0 = arith.constant 0 : i32
    return %arg0, %c0_i32 : i32, i32
  }
}

</mosaic_0001>

<bundles_post_ra>
// kernel: tpu_custom_call.1
= control target key start
LH: loop header
LB: loop body
LE: loop exit
PB: predicated region body
PF: predicated region fallthrough
CT: control target
= control target key end

     0   :  { %7 = vsyncpa [#allocation5], 0  ;;  %s287_s0 = inlined_call_operand.hbm [shape: f32[16,128], index: 0, kind: input, shape index: {}]   ;;  %s288_s1 = inlined_call_operand.hbm [shape: f32[16,128], index: 1, kind: input, shape index: {}]   ;;  %s289_s2 = inlined_call_operand.hbm [shape: f32[1,2], index: 2, kind: output, shape index: {}]  }
   0x1   :  { %8 = vsyncpa [#allocation8], 0 }
   0x2   :  { %9 = vsyncpa [#allocation6], 0  ;;  %s231_s9 = smov [#allocation4]   ;;  %s171_s13 = scalar_lea.hbm %s287_s0, 256 }
   0x3   :  { %s21_s10 = sshll.u32 %s231_s9, 4  ;;  %p172_p0 = scmp.ne.s32.totalorder %s287_s0, %s171_s13  ;;  %s22_s10 = int_to_ptr.vmem [resolvable:$true] %s21_s10 }
   0x4   :  { %p175_p1 = scmp.lt.u32.totalorder %s171_s13, %s287_s0 }
   0x6   :  { %p177_p2 = pnand %p175_p1, %p172_p0 }
   0x8   :  { %180 = shalt.err (!%p177_p2)
}
   0x9   :  { %s181_s18 = scalar_lea.vmem %s22_s10, 256  ;;  %p186_p4 = scmp.lt.s32.totalorder %s22_s10, %s22_s10 }
   0xa   :  { %p182_p3 = scmp.ne.s32.totalorder %s22_s10, %s181_s18  ;;  %p187_p5 = scmp.lt.s32.totalorder %s181_s18, %s181_s18 }
   0xc   :  { %p188_p6 = por %p187_p5, %p186_p4 }
   0xe   :  { %p189_p7 = pnand %p188_p6, %p182_p3 }
  0x10   :  { %192 = shalt.err (!%p189_p7)
}
  0x11   :  { %s232_s19 = smov 128   ;;  %s233_s20 = smov 8  }
  0x12   :  { %27 = dma.hbm_to_vmem [thread:$0]  %s287_s0, 256, %s22_s10, [#allocation5], %s232_s19, %s232_s19, %s233_s20  }
  0x13   :  { %s234_s23 = smov [#allocation7]   ;;  %s193_s27 = scalar_lea.hbm %s288_s1, 256 }
  0x14   :  { %s39_s24 = sshll.u32 %s234_s23, 4  ;;  %p194_p8 = scmp.ne.s32.totalorder %s288_s1, %s193_s27  ;;  %s40_s24 = int_to_ptr.vmem [resolvable:$true] %s39_s24 }
  0x15   :  { %p197_p9 = scmp.lt.u32.totalorder %s193_s27, %s288_s1 }
  0x17   :  { %p199_p10 = pnand %p197_p9, %p194_p8 }
  0x19   :  { %202 = shalt.err (!%p199_p10)
}
  0x1a   :  { %s203_s4 = scalar_lea.vmem %s40_s24, 256  ;;  %p208_p12 = scmp.lt.s32.totalorder %s40_s24, %s40_s24 }
  0x1b   :  { %p204_p11 = scmp.ne.s32.totalorder %s40_s24, %s203_s4  ;;  %p209_p13 = scmp.lt.s32.totalorder %s203_s4, %s203_s4 }
  0x1d   :  { %p210_p0 = por %p209_p13, %p208_p12 }
  0x1f   :  { %p211_p1 = pnand %p210_p0, %p204_p11 }
  0x21   :  { %214 = shalt.err (!%p211_p1)
}
  0x22   :  { %45 = dma.hbm_to_vmem [thread:$0]  %s288_s1, 256, %s40_s24, [#allocation8], %s232_s19, %s232_s19, %s233_s20  }
  0x23   :  { %225 = dma.done.wait [#allocation5], 256  }
  0x24   :  { %226 = vsyncadd [#allocation5], 4294967040 }
  0x25   :  { %227 = dma.done.wait [#allocation8], 256  }
  0x26   :  { %228 = vsyncadd [#allocation8], 4294967040  ;;  %v73_v0 = vld [vmem:[#allocation4] sm:$0xff]  ;;  %v74_v1 = vld [vmem:[#allocation4 + $0x8] sm:$0xff]  ;;  %s215_s9 = scalar_lea.hbm %s289_s2, 16 }
  0x27   :  { %v75_v2 = vld [vmem:[#allocation7] sm:$0xff]  ;;  %v76_v3 = vld [vmem:[#allocation7 + $0x8] sm:$0xff]  ;;  %v84_v7 = vadd.f32 %v74_v1, %v73_v0  ;;  %p216_p2 = scmp.ne.s32.totalorder %s289_s2, %s215_s9  ;;  %p219_p3 = scmp.lt.u32.totalorder %s215_s9, %s289_s2 }
  0x28   :  { %v77_v4 = vmul.f32 %v75_v2, %v73_v0  ;;  %v78_v5 = vmul.f32 %v76_v3, %v74_v1 }
  0x29   :  { %p221_p4 = pnand %p219_p3, %p216_p2 }
  0x2a   :  { %v80_v6 = vadd.f32 %v78_v5, %v77_v4 }
  0x2c   :  { %120 = vadd.xlane.f32.xlu0 %v80_v6 }
  0x30   :  { %132 = vadd.xlane.f32.xlu0 %v84_v7 }
  0xb9   :  { %v121_v8 = vpop.xlane.xlu0 %120 }
  0xba   :  { %v122_v9 = vrot.slane %v121_v8, 4 }
  0xbc   :  { %v123_v10 = vadd.f32 %v122_v9, %v121_v8 }
  0xbd   :  { %v133_v11 = vpop.xlane.xlu0 %132 }
  0xbe   :  { %v124_v12 = vrot.slane %v123_v10, 2  ;;  %v134_v13 = vrot.slane %v133_v11, 4 }
  0xc0   :  { %v135_v14 = vadd.f32 %v134_v13, %v133_v11  ;;  %v125_v15 = vadd.f32 %v124_v12, %v123_v10 }
  0xc2   :  { %v136_v16 = vrot.slane %v135_v14, 2  ;;  %v126_v17 = vrot.slane %v125_v15, 1 }
  0xc4   :  { %v137_v18 = vadd.f32 %v136_v16, %v135_v14  ;;  %v127_v19 = vadd.f32 %v126_v17, %v125_v15 }
  0xc6   :  { %162 = vpush %v127_v19  ;;  %v138_v20 = vrot.slane %v137_v18, 1 }
  0xc8   :  { %v139_v21 = vadd.f32 %v138_v20, %v137_v18 }
  0xca   :  { %164 = vpush %v139_v21 }
  0xf7   :  { %s163_s1 = spop %162 }
  0xf8   :  { %130 = sst [smem:[#allocation9]] %s163_s1 }
  0xfb   :  { %s165_s6 = spop %164 }
  0xfc   :  { %142 = sst [smem:[#allocation9 + $0x1]] %s165_s6 }
  0xfd   :  { %224 = shalt.err (!%p221_p4)
}
  0xfe   :  { %s235_s14 = smov [#allocation9]  }
  0xff   :  { %150 = dma.smem_to_hbm %s235_s14, 16, %s289_s2, [#allocation6]  }
 0x100   :  { %229 = dma.done.wait [#allocation6], 16  }
 0x101   :  { %230 = vsyncadd [#allocation6], 4294967280 }
 0x102   :  { %154 = sfence }
 0x103   :  { %155 = vsyncpa [#allocation5], 1 }
 0x104   :  { %156 = vsyncpa [#allocation8], 1 }
 0x105   :  { %157 = vsyncpa [#allocation6], 1 }

</bundles_post_ra>
